<compile_context>
chip_gen: v7x
topology: tpu7x:2x2x1
jax: 0.10.0
libtpu: 0.0.40
codegen_flags: <defaults>
</compile_context>

<pallas_src>
import jax
import jax.numpy as jnp
import numpy as np
from jax.experimental import pallas as pl
from jax.experimental.pallas import tpu as pltpu


def spatial_softmax_kernel(x_ref, w_ref, b_ref, p_ref, o_ref):
    # x_ref: (B*C, HW)   feature map in natural layout (rows b*C + c)
    # w_ref: (B*K, B*C)  block-diagonal (1/T)-scaled 1x1 conv weight
    # b_ref: (B*K, 1)    (1/T)-scaled bias, tiled per batch
    # p_ref: (HW, 3)     [ones | pos_x | pos_y]
    # o_ref: (B*K, 2)    expected keypoint coordinates (rows b*K + k)

    # Conv + bias + 1/T for every batch element in one MXU matmul + VPU add.
    logits = jnp.dot(w_ref[...], x_ref[...],
                     preferred_element_type=jnp.float32) + b_ref[...]   # (B*K, HW)

    # Softmax stabilization: single row-wise XLU max over the whole slab.
    m = jnp.max(logits, axis=-1, keepdims=True)                          # (B*K, 1)
    e = jnp.exp(logits - m)                                              # (B*K, HW) unnormalized

    # All weighted sums at once on the otherwise-idle MXU:
    #   sums[:, 0] = sum(e), sums[:, 1] = sum(e * pos_x), sums[:, 2] = sum(e * pos_y)
    sums = jnp.dot(e, p_ref[...], preferred_element_type=jnp.float32)    # (B*K, 3)

    inv_s = 1.0 / sums[:, 0:1]                                           # exact (tolerance-safe)
    o_ref[...] = (sums[:, 1:3] * inv_s).astype(o_ref.dtype)              # single store


def spatial_softmax(feature, weight, bias, pos_xy, temperature):
    """feature: [B, C, H, W] f32; weight: [K, C]; bias: [K]; pos_xy: [H*W, 2]."""
    B, C, H, W = feature.shape
    K = weight.shape[0]
    HW = H * W

    # Temperature is a (non-learnable) Python float here -> trace-time constant.
    # TODO(synk): for learnable_temperature=True pass inv_temp as a kernel input
    # instead of folding it into the weights/bias at trace time.
    inv_temp = jnp.float32(1.0 / float(temperature))

    # Feature: pure metadata reshape of contiguous dims — no data movement,
    # no extra HBM round-trip (this replaces the old transpose + concatenate).
    x = feature.reshape(B * C, HW)

    # Parameter-sized (tiny) trace-time constructions; these touch only O(K*C)
    # and O(HW) data and could be hoisted/precomputed once per model.
    w_blk = jnp.kron(jnp.eye(B, dtype=jnp.float32), weight * inv_temp)        # (B*K, B*C)
    b_col = jnp.tile(bias * inv_temp, B)[:, None]                             # (B*K, 1)
    p_mat = jnp.concatenate([jnp.ones((HW, 1), jnp.float32), pos_xy], axis=1)  # (HW, 3)

    vmem = pltpu.MemorySpace.VMEM
    out = pl.pallas_call(
        spatial_softmax_kernel,
        out_shape=jax.ShapeDtypeStruct((B * K, 2), jnp.float32),
        in_specs=[pl.BlockSpec(memory_space=vmem)] * 4,
        out_specs=pl.BlockSpec(memory_space=vmem),
    )(x, w_blk, b_col, p_mat)

    # Row order is b*K + k, identical to the PyTorch .view(-1, K, 2).
    return out.reshape(B, K, 2)


def spatial_softmax_reference(feature, weight, bias, pos_xy, temperature):
    B, C, H, W = feature.shape
    K = weight.shape[0]
    feat = jnp.einsum('kc,bcs->bks', weight, feature.reshape(B, C, H * W))
    feat = feat + bias[None, :, None]
    feat = feat.reshape(B * K, H * W)
    attn = jax.nn.softmax(feat / temperature, axis=-1)
    exy = attn @ pos_xy                                                   # (B*K, 2)
    return exy.reshape(B, K, 2)


if __name__ == "__main__":
    # Module config: input_shape=(C,H,W)=(4,16,16), num_kp=8, temperature=0.5,
    # output_variance=False, eval mode.
    B, C, H, W, K = 2, 4, 16, 16, 8
    temperature = 0.5

    key = jax.random.PRNGKey(0)
    k_feat, k_w, k_b = jax.random.split(key, 3)
    feature = jax.random.normal(k_feat, (B, C, H, W), dtype=jnp.float32)

    # Deterministic 1x1-conv parameters (synthetic, not a checkpoint load).
    fan_in = C  # kernel_size=1
    bound = 1.0 / np.sqrt(fan_in)
    weight = jax.random.uniform(k_w, (K, C), jnp.float32, -bound, bound)
    bias = jax.random.uniform(k_b, (K,), jnp.float32, -bound, bound)

    # Pixel-coordinate grids, identical to np.meshgrid(linspace_w, linspace_h).
    px, py = np.meshgrid(np.linspace(-1.0, 1.0, W), np.linspace(-1.0, 1.0, H))
    pos_xy = jnp.asarray(
        np.stack([px.reshape(-1), py.reshape(-1)], axis=-1), jnp.float32)  # (HW, 2)

    out = spatial_softmax(feature, weight, bias, pos_xy, temperature)
    out = jax.block_until_ready(out)

    ref = spatial_softmax_reference(feature, weight, bias, pos_xy, temperature)
    assert out.shape == (B, K, 2)
    np.testing.assert_allclose(np.asarray(out), np.asarray(ref), atol=1e-5, rtol=1e-5)

    # TODO(synk): output_variance=True branch and training-time Gaussian noise
    # are not exercised (module defaults / eval mode).
    print("KERNEL_OK")
</pallas_src>

<mosaic_0001>
module attributes {stable_mosaic.version = 11 : i64} {
  func.func @spatial_softmax_kernel(%arg0: memref<8x256xf32, #tpu.memory_space<vmem>>, %arg1: memref<16x8xf32, #tpu.memory_space<vmem>>, %arg2: memref<16x1xf32, #tpu.memory_space<vmem>>, %arg3: memref<256x3xf32, #tpu.memory_space<vmem>>, %arg4: memref<16x2xf32, #tpu.memory_space<vmem>>) attributes {dimension_semantics = [], scalar_prefetch = 0 : i64, scratch_operands = 0 : i64, tpu.core_type = #tpu.core_type<tc>} {
    %c0 = arith.constant 0 : index
    %c0_0 = arith.constant 0 : index
    %0 = vector.load %arg1[%c0, %c0_0] : memref<16x8xf32, #tpu.memory_space<vmem>>, vector<16x8xf32>
    %c0_1 = arith.constant 0 : index
    %c0_2 = arith.constant 0 : index
    %1 = vector.load %arg0[%c0_1, %c0_2] : memref<8x256xf32, #tpu.memory_space<vmem>>, vector<8x256xf32>
    %cst = arith.constant dense<0.000000e+00> : vector<16x256xf32>
    %2 = tpu.matmul %0, %1, %cst {dimension_numbers = #tpu.dot_dimension_numbers<[1], [0], [0], [1], [0, 0, 1, 1], [], []>} : vector<16x8xf32>, vector<8x256xf32>, vector<16x256xf32> -> vector<16x256xf32>
    %c0_3 = arith.constant 0 : index
    %c0_4 = arith.constant 0 : index
    %3 = vector.load %arg2[%c0_3, %c0_4] : memref<16x1xf32, #tpu.memory_space<vmem>>, vector<16x1xf32>
    %4 = vector.broadcast %3 : vector<16x1xf32> to vector<16x256xf32>
    %5 = arith.addf %2, %4 : vector<16x256xf32>
    %cst_5 = arith.constant dense<0xFF800000> : vector<16xf32>
    %6 = vector.multi_reduction <maximumf>, %5, %cst_5 [1] : vector<16x256xf32> to vector<16xf32>
    %7 = vector.shape_cast %6 : vector<16xf32> to vector<16x1xf32>
    %8 = vector.broadcast %7 : vector<16x1xf32> to vector<16x256xf32>
    %9 = arith.subf %5, %8 : vector<16x256xf32>
    %10 = math.exp %9 : vector<16x256xf32>
    %c0_6 = arith.constant 0 : index
    %c0_7 = arith.constant 0 : index
    %11 = vector.load %arg3[%c0_6, %c0_7] : memref<256x3xf32, #tpu.memory_space<vmem>>, vector<256x3xf32>
    %cst_8 = arith.constant dense<0.000000e+00> : vector<16x3xf32>
    %12 = tpu.matmul %10, %11, %cst_8 {dimension_numbers = #tpu.dot_dimension_numbers<[1], [0], [0], [1], [0, 0, 1, 1], [], []>} : vector<16x256xf32>, vector<256x3xf32>, vector<16x3xf32> -> vector<16x3xf32>
    %13 = vector.extract_strided_slice %12 {offsets = [0, 0], sizes = [16, 1], strides = [1, 1]} : vector<16x3xf32> to vector<16x1xf32>
    %cst_9 = arith.constant 1.000000e+00 : f32
    %14 = vector.broadcast %cst_9 : f32 to vector<16x1xf32>
    %15 = arith.divf %14, %13 : vector<16x1xf32>
    %16 = vector.extract_strided_slice %12 {offsets = [0, 1], sizes = [16, 2], strides = [1, 1]} : vector<16x3xf32> to vector<16x2xf32>
    %17 = vector.broadcast %15 : vector<16x1xf32> to vector<16x2xf32>
    %18 = arith.mulf %16, %17 : vector<16x2xf32>
    %c0_10 = arith.constant 0 : index
    %c0_11 = arith.constant 0 : index
    %19 = vector.load %arg4[%c0_10, %c0_11] : memref<16x2xf32, #tpu.memory_space<vmem>>, vector<16x2xf32>
    tpu.vector_store %arg4[%c0_10, %c0_11], %18 {strides = array<i32>} : memref<16x2xf32, #tpu.memory_space<vmem>>, vector<16x2xf32>,
    return
  }
}

</mosaic_0001>

<bundles_post_ra>
// kernel: tpu_custom_call.1
= control target key start
LH: loop header
LB: loop body
LE: loop exit
PB: predicated region body
PF: predicated region fallthrough
CT: control target
= control target key end

     0   :  { %v378_v2 = vmov 0.0   ;;  %vm33_vm0 = vcmask 64512   ;;  %v379_v4 = vmov 0   ;;  %vm266_vm1 = vcmask 15360   ;;  %s526_s0 = inlined_call_operand.vmem [shape: f32[8,256], index: 0, kind: input, shape index: {}]   ;;  %s527_s1 = inlined_call_operand.vmem [shape: f32[16,8], index: 1, kind: input, shape index: {}]   ;;  %s528_s2 = inlined_call_operand.vmem [shape: f32[16,1], index: 2, kind: input, shape index: {}]   ;;  %s529_s3 = inlined_call_operand.vmem [shape: f32[256,3], index: 3, kind: input, shape index: {}]   ;;  %s530_s4 = inlined_call_operand.vmem [shape: f32[16,2], index: 4, kind: output, shape index: {}]  }
   0x1   :  { %v20_v0 = vld [vmem:[%s526_s0 + $0x8] sm:$0xff]  ;;  %v19_v1 = vld [vmem:[%s526_s0] sm:$0xff]  ;;  %104 = vmatprep.mubr.f32.mxu0 %v378_v2  ;;  %364 = vset.pattern.permute.xlu0 %v379_v4  ;;  %v153_v13 = vld [vmem:[%s529_s3 + $0x90] sm:$0xff] }
   0x2   :  { %v17_v3 = vld [vmem:[%s527_s1] sm:$0xff]  ;;  %40 = vmatprep.subr.mxu0 %v20_v0  ;;  %365 = vset.pattern.permute.xlu1 %v379_v4  ;;  %v22_v6 = vld [vmem:[%s528_s2 + $0x8] sm:$0xff]  ;;  %v154_v14 = vld [vmem:[%s529_s3 + $0x98] sm:$0xff] }
   0x3   :  { %v21_v5 = vld [vmem:[%s528_s2] sm:$0xff]  ;;  %41 = vmatpush1.msra.mxu0 %v19_v1  ;;  %v18_v7 = vld [vmem:[%s527_s1 + $0x8] sm:$0xff]  ;;  %v317_v16 = vpack.c.bf16 %v154_v14, %v153_v13  ;;  %v137_v17 = vld [vmem:[%s529_s3 + $0x10] sm:$0xff] }
   0x4   :  { %25 = vperm.xlu0 %364, %v21_v5   ;;  %273 = vmatmul.mubr.msk.f32.vlgmr.msra.gmra.mrb[0].mxu0 %vm33_vm0, %v17_v3  ;;  %v151_v8 = vld [vmem:[%s529_s3 + $0x80] sm:$0xff]  ;;  %v152_v9 = vld [vmem:[%s529_s3 + $0x88] sm:$0xff]  ;;  %v138_v18 = vld [vmem:[%s529_s3 + $0x18] sm:$0xff] }
   0x5   :  { %110 = vmatprep.mubr.f32.mxu0 %v378_v2  ;;  %v135_v10 = vld [vmem:[%s529_s3] sm:$0xff]  ;;  %v313_v11 = vpack.c.bf16 %v152_v9, %v151_v8  ;;  %v136_v12 = vld [vmem:[%s529_s3 + $0x8] sm:$0xff]  ;;  %v319_v21 = vpack.c.bf16 %v138_v18, %v137_v17  ;;  %v157_v25 = vld [vmem:[%s529_s3 + $0xb0] sm:$0xff] }
   0x6   :  { %v315_v15 = vpack.c.bf16 %v136_v12, %v135_v10  ;;  %v155_v19 = vld [vmem:[%s529_s3 + $0xa0] sm:$0xff]  ;;  %v156_v20 = vld [vmem:[%s529_s3 + $0xa8] sm:$0xff]  ;;  %v158_v26 = vld [vmem:[%s529_s3 + $0xb8] sm:$0xff] }
   0x7   :  { %314 = vmatprep.subr.bf16.mxu0 %v313_v11  ;;  %345 = vmatprep.subr.bf16.mxu1 %v313_v11  ;;  %v321_v22 = vpack.c.bf16 %v156_v20, %v155_v19  ;;  %v139_v23 = vld [vmem:[%s529_s3 + $0x20] sm:$0xff]  ;;  %v140_v24 = vld [vmem:[%s529_s3 + $0x28] sm:$0xff]  ;;  %v325_v28 = vpack.c.bf16 %v158_v26, %v157_v25  ;;  %v141_v29 = vld [vmem:[%s529_s3 + $0x30] sm:$0xff] }
   0x8   :  { %30 = vperm.xlu0 %364, %v22_v6   ;;  %274 = vmatmul.mubr.msk.f32.gmra.mrb[2].mxu0 %vm33_vm0, %v18_v7  ;;  %v323_v27 = vpack.c.bf16 %v140_v24, %v139_v23  ;;  %v142_v30 = vld [vmem:[%s529_s3 + $0x38] sm:$0xff]  ;;  %v159_v44 = vld [vmem:[%s529_s3 + $0xc0] sm:$0xff]  ;;  %v160_v45 = vld [vmem:[%s529_s3 + $0xc8] sm:$0xff] }
   0x9   :  { %316 = vmatpush3.bf16.msra.mxu0 %v315_v15  ;;  %353 = vmatpush3.bf16.msra.mxu1 %v315_v15  ;;  %v327_v31 = vpack.c.bf16 %v142_v30, %v141_v29  ;;  %v329_v46 = vpack.c.bf16 %v160_v45, %v159_v44  ;;  %v143_v47 = vld [vmem:[%s529_s3 + $0x40] sm:$0xff]  ;;  %v144_v48 = vld [vmem:[%s529_s3 + $0x48] sm:$0xff]  ;;  %v161_v50 = vld [vmem:[%s529_s3 + $0xd0] sm:$0xff] }
   0xa   :  { %318 = vmatprep.subr.bf16.mxu0 %v317_v16  ;;  %346 = vmatprep.subr.bf16.mxu1 %v317_v16  ;;  %v331_v49 = vpack.c.bf16 %v144_v48, %v143_v47  ;;  %v162_v51 = vld [vmem:[%s529_s3 + $0xd8] sm:$0xff]  ;;  %v145_v53 = vld [vmem:[%s529_s3 + $0x50] sm:$0xff]  ;;  %v163_v56 = vld [vmem:[%s529_s3 + $0xe0] sm:$0xff] }
   0xb   :  { %v333_v52 = vpack.c.bf16 %v162_v51, %v161_v50  ;;  %v146_v54 = vld [vmem:[%s529_s3 + $0x58] sm:$0xff]  ;;  %v164_v57 = vld [vmem:[%s529_s3 + $0xe8] sm:$0xff]  ;;  %v147_v59 = vld [vmem:[%s529_s3 + $0x60] sm:$0xff] }
   0xc   :  { %v335_v55 = vpack.c.bf16 %v146_v54, %v145_v53  ;;  %v337_v58 = vpack.c.bf16 %v164_v57, %v163_v56  ;;  %v148_v60 = vld [vmem:[%s529_s3 + $0x68] sm:$0xff]  ;;  %v165_v62 = vld [vmem:[%s529_s3 + $0xf0] sm:$0xff]  ;;  %v166_v63 = vld [vmem:[%s529_s3 + $0xf8] sm:$0xff] }
   0xd   :  { %320 = vmatpush3.bf16.msra.mxu0 %v319_v21  ;;  %354 = vmatpush3.bf16.msra.mxu1 %v319_v21  ;;  %v339_v61 = vpack.c.bf16 %v148_v60, %v147_v59  ;;  %v149_v0 = vld [vmem:[%s529_s3 + $0x70] sm:$0xff]  ;;  %v341_v1 = vpack.c.bf16 %v166_v63, %v165_v62  ;;  %v150_v2 = vld [vmem:[%s529_s3 + $0x78] sm:$0xff]  ;;  %s380_s3 = smov 127  }
   0xe   :  { %322 = vmatprep.subr.bf16.mxu0 %v321_v22  ;;  %347 = vmatprep.subr.bf16.mxu1 %v321_v22  ;;  %v343_v3 = vpack.c.bf16 %v150_v2, %v149_v0 }
  0x11   :  { %324 = vmatpush3.bf16.msra.mxu0 %v323_v27  ;;  %355 = vmatpush3.bf16.msra.mxu1 %v323_v27 }
  0x12   :  { %326 = vmatprep.subr.bf16.mxu0 %v325_v28  ;;  %348 = vmatprep.subr.bf16.mxu1 %v325_v28 }
  0x15   :  { %328 = vmatpush3.bf16.msra.mxu0 %v327_v31  ;;  %356 = vmatpush3.bf16.msra.mxu1 %v327_v31 }
  0x16   :  { %330 = vmatprep.subr.bf16.mxu0 %v329_v46  ;;  %349 = vmatprep.subr.bf16.mxu1 %v329_v46 }
  0x19   :  { %332 = vmatpush3.bf16.msra.mxu0 %v331_v49  ;;  %357 = vmatpush3.bf16.msra.mxu1 %v331_v49 }
  0x1a   :  { %334 = vmatprep.subr.bf16.mxu0 %v333_v52  ;;  %350 = vmatprep.subr.bf16.mxu1 %v333_v52 }
  0x1d   :  { %336 = vmatpush3.bf16.msra.mxu0 %v335_v55  ;;  %358 = vmatpush3.bf16.msra.mxu1 %v335_v55 }
  0x1e   :  { %338 = vmatprep.subr.bf16.mxu0 %v337_v58  ;;  %351 = vmatprep.subr.bf16.mxu1 %v337_v58 }
  0x21   :  { %340 = vmatpush3.bf16.msra.mxu0 %v339_v61  ;;  %359 = vmatpush3.bf16.msra.mxu1 %v339_v61 }
  0x22   :  { %342 = vmatprep.subr.bf16.mxu0 %v341_v1  ;;  %352 = vmatprep.subr.bf16.mxu1 %v341_v1 }
  0x25   :  { %344 = vmatpush3.bf16.msra.mxu0 %v343_v3  ;;  %360 = vmatpush3.bf16.msra.mxu1 %v343_v3 }
  0x83   :  { %v26_v32 = vpop.permute.xlu0 %25 }
  0x87   :  { %v31_v37 = vpop.permute.xlu0 %30 }
  0xd7   :  { %v106_v33 = vpop.f32.mrb[0].mxu0 }
  0xd8   :  { %v107_v34 = vadd.f32 %v106_v33, %v26_v32  ;;  %v108_v35 = vpop.f32.mrb[1].mxu0 }
  0xd9   :  { %v109_v36 = vadd.f32 %v108_v35, %v26_v32 }
  0xdb   :  { %v112_v38 = vpop.f32.mrb[2].mxu0  ;;  %v117_v39 = vmax.f32 %v107_v34, %v109_v36 }
  0xdc   :  { %v113_v40 = vadd.f32 %v112_v38, %v31_v37  ;;  %v114_v41 = vpop.f32.mrb[3].mxu0 }
  0xdd   :  { %v115_v42 = vadd.f32 %v114_v41, %v31_v37  ;;  %118 = vmax.xlane.f32.xlu1 %v117_v39 }
  0xdf   :  { %v120_v43 = vmax.f32 %v113_v40, %v115_v42 }
  0xe1   :  { %121 = vmax.xlane.f32.xlu1 %v120_v43 }
 0x16a   :  { %v119_v4 = vpop.xlane.xlu1 %118 }
 0x16b   :  { %v123_v5 = vsub.f32 %v107_v34, %v119_v4  ;;  %v124_v6 = vsub.f32 %v109_v36, %v119_v4 }
 0x16d   :  { %v127_v7 = vmul.f32 1.442695, %v123_v5  ;;  %v129_v8 = vmul.f32 1.442695, %v124_v6 }
 0x16e   :  { %v122_v9 = vpop.xlane.xlu1 %121 }
 0x16f   :  { %366 = vpow2.f32 %v127_v7  ;;  %v125_v10 = vsub.f32 %v113_v40, %v122_v9  ;;  %v126_v11 = vsub.f32 %v115_v42, %v122_v9 }
 0x170   :  { %368 = vpow2.f32 %v129_v8 }
 0x171   :  { %v131_v12 = vmul.f32 1.442695, %v125_v10  ;;  %v133_v13 = vmul.f32 1.442695, %v126_v11 }
 0x173   :  { %370 = vpow2.f32 %v131_v12 }
 0x174   :  { %372 = vpow2.f32 %v133_v13 }
 0x179   :  { %v367_v14 = vpop.eup %366 }
 0x17a   :  { %v369_v15 = vpop.eup %368 }
 0x17b   :  { %231 = vmatprep.mubr.f32.mxu0 %v369_v15 }
 0x17c   :  { %232 = vmatmul.mubr.f32.vlgmr.msra.gmra.mrb[4].mxu0 %v367_v14 }
 0x17d   :  { %v371_v16 = vpop.eup %370 }
 0x17e   :  { %v373_v17 = vpop.eup %372 }
 0x17f   :  { %236 = vmatprep.mubr.f32.mxu1 %v373_v17 }
 0x180   :  { %237 = vmatmul.mubr.f32.vlgmr.msra.gmra.mrb[0].mxu1 %v371_v16 }
 0x24f   :  { %v307_v18 = vpop.f32.mrb[4].mxu0 }
 0x250   :  { %v308_v19 = vpop.f32.mrb[5].mxu0 }
 0x251   :  { %v309_v20 = vadd.f32 %v308_v19, %v307_v18 }
 0x253   :  { %374 = vrcp.f32 %v309_v20  ;;  %v310_v21 = vpop.f32.mrb[0].mxu1 }
 0x254   :  { %v311_v22 = vpop.f32.mrb[1].mxu1 }
 0x255   :  { %v312_v23 = vadd.f32 %v311_v22, %v310_v21 }
 0x257   :  { %376 = vrcp.f32 %v312_v23 }
 0x25d   :  { %v375_v24 = vpop.eup %374 }
 0x25e   :  { %248 = vperm.xlu0 %364, %v375_v24  }
 0x261   :  { %v377_v25 = vpop.eup %376 }
 0x262   :  { %253 = vperm.xlu1 %365, %v377_v25  }
 0x2dd   :  { %v249_v26 = vpop.permute.xlu0 %248 }
 0x2de   :  { %v256_v27 = vmul.f32 %v309_v20, %v249_v26 }
 0x2e0   :  { %260 = vrot.lane.b32.xlu0 %v256_v27, %s380_s3 }
 0x2e1   :  { %v254_v28 = vpop.permute.xlu1 %253 }
 0x2e2   :  { %v257_v29 = vmul.f32 %v312_v23, %v254_v28 }
 0x2e4   :  { %262 = vrot.lane.b32.xlu0 %v257_v29, %s380_s3 }
 0x352   :  { %v261_v30 = vpop.permute.xlu0 %260 }
 0x353   :  { %267 = vst.msk [vmem:[%s530_s4] sm:$0xff] %vm266_vm1, %v261_v30 }
 0x356   :  { %v263_v31 = vpop.permute.xlu0 %262 }
 0x357   :  { %268 = vst.msk [vmem:[%s530_s4 + $0x8] sm:$0xff] %vm266_vm1, %v263_v31 }

</bundles_post_ra>
